<compile_context>
chip_gen: v5e
topology: v5e:2x2
jax: 0.10.0
libtpu: 0.0.40
codegen_flags: <defaults>
</compile_context>

<pallas_src>
import numpy as np
import jax
import jax.numpy as jnp
from jax.experimental import pallas as pl
from jax.experimental.pallas import tpu as pltpu

LANE = 128
SUBLANE = 8


def _round_up(x, m):
    return (x + m - 1) // m * m


def mlp_kernel(x_ref, w1_ref, b1_ref, w2_ref, b2_ref, w3_ref, b3_ref, o_ref):
    # x: [TM, Din_p] bf16 ; w1: [Din_p, 128] bf16 ; w2: [128, 128] bf16
    # w3: [128, Dout_p] bf16 ; biases: [1, H] f32 (broadcast over rows)
    x = x_ref[...]

    h1 = jnp.dot(x, w1_ref[...], preferred_element_type=jnp.float32) + b1_ref[...]
    h1 = jnp.maximum(h1, 0.0).astype(w2_ref.dtype)      # f32 ReLU, bf16 into MXU

    h2 = jnp.dot(h1, w2_ref[...], preferred_element_type=jnp.float32) + b2_ref[...]
    h2 = jnp.maximum(h2, 0.0).astype(w3_ref.dtype)

    h3 = jnp.dot(h2, w3_ref[...], preferred_element_type=jnp.float32) + b3_ref[...]
    h3 = jnp.maximum(h3, 0.0)

    o_ref[...] = h3.astype(o_ref.dtype)


def mlp_forward(x, params, *, compute_dtype=jnp.bfloat16, tm_max=512):
    """x: any shape [B, ...]; flattened to [B, input_size] like x.view(B, -1)."""
    w1, b1, w2, b2, w3, b3 = params
    B = x.shape[0]
    x2d = x.reshape(B, -1)
    d_in = x2d.shape[1]
    hidden = w1.shape[1]
    d_out = w3.shape[1]

    # lane-dense padded sizes
    d_in_p = _round_up(d_in, LANE)
    h_p = _round_up(hidden, LANE)
    d_out_p = _round_up(d_out, LANE)

    # Batch tile: as large as possible, but keep double-buffered x/out tiles
    # comfortably under the default scoped VMEM on every TPU generation
    # (incl. v7x's smaller VMEM) even for a generic, large input_size.
    in_bytes = np.dtype(compute_dtype).itemsize
    bytes_per_row = d_in_p * in_bytes + d_out_p * 4        # x tile + f32 out tile
    budget = 8 * 1024 * 1024                               # per-buffer budget
    tm_cap = max(SUBLANE, (budget // bytes_per_row) // SUBLANE * SUBLANE)
    TM = min(tm_max, tm_cap, _round_up(B, SUBLANE))
    B_p = _round_up(B, TM)

    # Zero-pad everything (zero weights/biases keep the padded lanes at 0
    # through every ReLU layer, so results in the valid region are exact).
    xp = jnp.zeros((B_p, d_in_p), compute_dtype).at[:B, :d_in].set(
        x2d.astype(compute_dtype))
    w1p = jnp.zeros((d_in_p, h_p), compute_dtype).at[:d_in, :hidden].set(
        w1.astype(compute_dtype))
    b1p = jnp.zeros((1, h_p), jnp.float32).at[:, :hidden].set(
        b1.reshape(1, -1).astype(jnp.float32))
    w2p = jnp.zeros((h_p, h_p), compute_dtype).at[:hidden, :hidden].set(
        w2.astype(compute_dtype))
    b2p = jnp.zeros((1, h_p), jnp.float32).at[:, :hidden].set(
        b2.reshape(1, -1).astype(jnp.float32))
    w3p = jnp.zeros((h_p, d_out_p), compute_dtype).at[:hidden, :d_out].set(
        w3.astype(compute_dtype))
    b3p = jnp.zeros((1, d_out_p), jnp.float32).at[:, :d_out].set(
        b3.reshape(1, -1).astype(jnp.float32))

    const = lambda shape: pl.BlockSpec(shape, lambda i, _s=shape: (0,) * len(_s))

    out = pl.pallas_call(
        mlp_kernel,
        out_shape=jax.ShapeDtypeStruct((B_p, d_out_p), jnp.float32),
        grid=(B_p // TM,),
        in_specs=[
            pl.BlockSpec((TM, d_in_p), lambda i: (i, 0)),   # streamed batch tiles
            const(w1p.shape), const(b1p.shape),             # VMEM-resident params
            const(w2p.shape), const(b2p.shape),
            const(w3p.shape), const(b3p.shape),
        ],
        out_specs=pl.BlockSpec((TM, d_out_p), lambda i: (i, 0)),
        compiler_params=pltpu.CompilerParams(
            dimension_semantics=("parallel",),              # megacore on v7x
        ),
    )(xp, w1p, b1p, w2p, b2p, w3p, b3p)

    return out[:B, :d_out]


def init_params(key, input_size, output_size, hidden=64):
    ks = jax.random.split(key, 6)
    scale = 0.1
    w1 = scale * jax.random.normal(ks[0], (input_size, hidden), jnp.float32)
    b1 = scale * jax.random.normal(ks[1], (1, hidden), jnp.float32)
    w2 = scale * jax.random.normal(ks[2], (hidden, hidden), jnp.float32)
    b2 = scale * jax.random.normal(ks[3], (1, hidden), jnp.float32)
    w3 = scale * jax.random.normal(ks[4], (hidden, output_size), jnp.float32)
    b3 = scale * jax.random.normal(ks[5], (1, output_size), jnp.float32)
    return (w1, b1, w2, b2, w3, b3)


def mlp_reference(x, params):
    w1, b1, w2, b2, w3, b3 = params
    h = x.reshape(x.shape[0], -1).astype(jnp.float32)
    h = jnp.maximum(h @ w1 + b1, 0.0)
    h = jnp.maximum(h @ w2 + b2, 0.0)
    h = jnp.maximum(h @ w3 + b3, 0.0)
    return h


if __name__ == "__main__":
    key = jax.random.PRNGKey(0)
    k_x, k_p = jax.random.split(key)

    # Input mimicking an image-like tensor that the module flattens:
    # [batch=2, channels=4, 4, 4] -> input_size = 64, output_size = 16
    x = jax.random.normal(k_x, (2, 4, 4, 4), jnp.float32)
    input_size = 4 * 4 * 4
    output_size = 16

    params = init_params(k_p, input_size, output_size)

    out = jax.block_until_ready(mlp_forward(x, params))
    ref = mlp_reference(x, params)

    assert out.shape == (2, output_size), out.shape
    # bf16 MXU operands with f32 accumulation -> ~1% relative tolerance
    assert jnp.allclose(out, ref, atol=3e-2, rtol=3e-2), "mismatch vs reference"

    print("KERNEL_OK")
</pallas_src>

<mosaic_0001>
module attributes {stable_mosaic.version = 11 : i64} {
  func.func @mlp_kernel(%arg0: i32, %arg1: memref<8x128xbf16, #tpu.memory_space<vmem>>, %arg2: memref<128x128xbf16, #tpu.memory_space<vmem>>, %arg3: memref<1x128xf32, #tpu.memory_space<vmem>>, %arg4: memref<128x128xbf16, #tpu.memory_space<vmem>>, %arg5: memref<1x128xf32, #tpu.memory_space<vmem>>, %arg6: memref<128x128xbf16, #tpu.memory_space<vmem>>, %arg7: memref<1x128xf32, #tpu.memory_space<vmem>>, %arg8: memref<8x128xf32, #tpu.memory_space<vmem>>) attributes {dimension_semantics = [#tpu.dimension_semantics<parallel>], iteration_bounds = array<i64: 1>, scalar_prefetch = 0 : i64, scratch_operands = 0 : i64, tpu.core_type = #tpu.core_type<tc>, window_params = [{transform_indices = @transform_0, window_bounds = array<i64: 8, 128>}, {pipeline_mode = #tpu.pipeline_mode<synchronous>, transform_indices = @transform_1, window_bounds = array<i64: 128, 128>}, {pipeline_mode = #tpu.pipeline_mode<synchronous>, transform_indices = @transform_2, window_bounds = array<i64: 1, 128>}, {pipeline_mode = #tpu.pipeline_mode<synchronous>, transform_indices = @transform_3, window_bounds = array<i64: 128, 128>}, {pipeline_mode = #tpu.pipeline_mode<synchronous>, transform_indices = @transform_4, window_bounds = array<i64: 1, 128>}, {pipeline_mode = #tpu.pipeline_mode<synchronous>, transform_indices = @transform_5, window_bounds = array<i64: 128, 128>}, {pipeline_mode = #tpu.pipeline_mode<synchronous>, transform_indices = @transform_6, window_bounds = array<i64: 1, 128>}, {transform_indices = @transform_7, window_bounds = array<i64: 8, 128>}]} {
    %c0 = arith.constant 0 : index
    %c0_0 = arith.constant 0 : index
    %0 = vector.load %arg1[%c0, %c0_0] : memref<8x128xbf16, #tpu.memory_space<vmem>>, vector<8x128xbf16>
    %c0_1 = arith.constant 0 : index
    %c0_2 = arith.constant 0 : index
    %1 = vector.load %arg2[%c0_1, %c0_2] : memref<128x128xbf16, #tpu.memory_space<vmem>>, vector<128x128xbf16>
    %cst = arith.constant dense<0.000000e+00> : vector<8x128xf32>
    %2 = tpu.matmul %0, %1, %cst {dimension_numbers = #tpu.dot_dimension_numbers<[1], [0], [0], [1], [0, 0, 1, 1], [], []>} : vector<8x128xbf16>, vector<128x128xbf16>, vector<8x128xf32> -> vector<8x128xf32>
    %c0_3 = arith.constant 0 : index
    %c0_4 = arith.constant 0 : index
    %3 = vector.load %arg3[%c0_3, %c0_4] : memref<1x128xf32, #tpu.memory_space<vmem>>, vector<1x128xf32>
    %4 = vector.broadcast %3 : vector<1x128xf32> to vector<8x128xf32>
    %5 = arith.addf %2, %4 : vector<8x128xf32>
    %cst_5 = arith.constant 0.000000e+00 : f32
    %6 = vector.broadcast %cst_5 : f32 to vector<8x128xf32>
    %7 = arith.maximumf %5, %6 : vector<8x128xf32>
    %8 = arith.truncf %7 : vector<8x128xf32> to vector<8x128xbf16>
    %c0_6 = arith.constant 0 : index
    %c0_7 = arith.constant 0 : index
    %9 = vector.load %arg4[%c0_6, %c0_7] : memref<128x128xbf16, #tpu.memory_space<vmem>>, vector<128x128xbf16>
    %cst_8 = arith.constant dense<0.000000e+00> : vector<8x128xf32>
    %10 = tpu.matmul %8, %9, %cst_8 {dimension_numbers = #tpu.dot_dimension_numbers<[1], [0], [0], [1], [0, 0, 1, 1], [], []>} : vector<8x128xbf16>, vector<128x128xbf16>, vector<8x128xf32> -> vector<8x128xf32>
    %c0_9 = arith.constant 0 : index
    %c0_10 = arith.constant 0 : index
    %11 = vector.load %arg5[%c0_9, %c0_10] : memref<1x128xf32, #tpu.memory_space<vmem>>, vector<1x128xf32>
    %12 = vector.broadcast %11 : vector<1x128xf32> to vector<8x128xf32>
    %13 = arith.addf %10, %12 : vector<8x128xf32>
    %cst_11 = arith.constant 0.000000e+00 : f32
    %14 = vector.broadcast %cst_11 : f32 to vector<8x128xf32>
    %15 = arith.maximumf %13, %14 : vector<8x128xf32>
    %16 = arith.truncf %15 : vector<8x128xf32> to vector<8x128xbf16>
    %c0_12 = arith.constant 0 : index
    %c0_13 = arith.constant 0 : index
    %17 = vector.load %arg6[%c0_12, %c0_13] : memref<128x128xbf16, #tpu.memory_space<vmem>>, vector<128x128xbf16>
    %cst_14 = arith.constant dense<0.000000e+00> : vector<8x128xf32>
    %18 = tpu.matmul %16, %17, %cst_14 {dimension_numbers = #tpu.dot_dimension_numbers<[1], [0], [0], [1], [0, 0, 1, 1], [], []>} : vector<8x128xbf16>, vector<128x128xbf16>, vector<8x128xf32> -> vector<8x128xf32>
    %c0_15 = arith.constant 0 : index
    %c0_16 = arith.constant 0 : index
    %19 = vector.load %arg7[%c0_15, %c0_16] : memref<1x128xf32, #tpu.memory_space<vmem>>, vector<1x128xf32>
    %20 = vector.broadcast %19 : vector<1x128xf32> to vector<8x128xf32>
    %21 = arith.addf %18, %20 : vector<8x128xf32>
    %cst_17 = arith.constant 0.000000e+00 : f32
    %22 = vector.broadcast %cst_17 : f32 to vector<8x128xf32>
    %23 = arith.maximumf %21, %22 : vector<8x128xf32>
    %c0_18 = arith.constant 0 : index
    %c0_19 = arith.constant 0 : index
    %24 = vector.load %arg8[%c0_18, %c0_19] : memref<8x128xf32, #tpu.memory_space<vmem>>, vector<8x128xf32>
    tpu.vector_store %arg8[%c0_18, %c0_19], %23 {strides = array<i32>} : memref<8x128xf32, #tpu.memory_space<vmem>>, vector<8x128xf32>,
    return
  }
  func.func @transform_0(%arg0: i32) -> (i32, i32) {
    %c0_i32 = arith.constant 0 : i32
    %c0_i32_0 = arith.constant 0 : i32
    return %arg0, %c0_i32 : i32, i32
  }
  func.func @transform_1(%arg0: i32) -> (i32, i32) {
    %c0_i32 = arith.constant 0 : i32
    %c0_i32_0 = arith.constant 0 : i32
    %c0_i32_1 = arith.constant 0 : i32
    return %c0_i32, %c0_i32_0 : i32, i32
  }
  func.func @transform_2(%arg0: i32) -> (i32, i32) {
    %c0_i32 = arith.constant 0 : i32
    %c0_i32_0 = arith.constant 0 : i32
    %c0_i32_1 = arith.constant 0 : i32
    return %c0_i32, %c0_i32_0 : i32, i32
  }
  func.func @transform_3(%arg0: i32) -> (i32, i32) {
    %c0_i32 = arith.constant 0 : i32
    %c0_i32_0 = arith.constant 0 : i32
    %c0_i32_1 = arith.constant 0 : i32
    return %c0_i32, %c0_i32_0 : i32, i32
  }
  func.func @transform_4(%arg0: i32) -> (i32, i32) {
    %c0_i32 = arith.constant 0 : i32
    %c0_i32_0 = arith.constant 0 : i32
    %c0_i32_1 = arith.constant 0 : i32
    return %c0_i32, %c0_i32_0 : i32, i32
  }
  func.func @transform_5(%arg0: i32) -> (i32, i32) {
    %c0_i32 = arith.constant 0 : i32
    %c0_i32_0 = arith.constant 0 : i32
    %c0_i32_1 = arith.constant 0 : i32
    return %c0_i32, %c0_i32_0 : i32, i32
  }
  func.func @transform_6(%arg0: i32) -> (i32, i32) {
    %c0_i32 = arith.constant 0 : i32
    %c0_i32_0 = arith.constant 0 : i32
    %c0_i32_1 = arith.constant 0 : i32
    return %c0_i32, %c0_i32_0 : i32, i32
  }
  func.func @transform_7(%arg0: i32) -> (i32, i32) {
    %c0_i32 = arith.constant 0 : i32
    %c0_i32_0 = arith.constant 0 : i32
    return %arg0, %c0_i32 : i32, i32
  }
}

</mosaic_0001>

<bundles_post_ra>
// kernel: tpu_custom_call.1
= control target key start
LH: loop header
LB: loop body
LE: loop exit
PB: predicated region body
PF: predicated region fallthrough
CT: control target
= control target key end

     0   :  { %12 = vsyncpa [#allocation3], 0  ;;  %s686_s0 = inlined_call_operand.hbm [shape: bf16[8,128], index: 0, kind: input, shape index: {}]   ;;  %s687_s1 = inlined_call_operand.hbm [shape: bf16[128,128], index: 1, kind: input, shape index: {}]   ;;  %s688_s2 = inlined_call_operand.vmem [shape: f32[1,128], index: 2, kind: input, shape index: {}]   ;;  %s689_s3 = inlined_call_operand.hbm [shape: bf16[128,128], index: 3, kind: input, shape index: {}]   ;;  %s690_s4 = inlined_call_operand.vmem [shape: f32[1,128], index: 4, kind: input, shape index: {}]   ;;  %s691_s5 = inlined_call_operand.hbm [shape: bf16[128,128], index: 5, kind: input, shape index: {}]   ;;  %s692_s6 = inlined_call_operand.vmem [shape: f32[1,128], index: 6, kind: input, shape index: {}]   ;;  %s693_s7 = inlined_call_operand.hbm [shape: f32[8,128], index: 7, kind: output, shape index: {}]  }
   0x1   :  { %13 = vsyncpa [#allocation6], 0 }
   0x2   :  { %14 = vsyncpa [#allocation9], 0  ;;  %s31_s26 = sshll.u32 %s687_s1, 4  ;;  %s32_s26 = int_to_ptr.hbm [resolvable:$true] %s31_s26 }
   0x3   :  { %15 = vsyncpa [#allocation4], 0  ;;  %s615_s27 = smov [#allocation5]   ;;  %s21_s8 = sshll.u32 %s686_s0, 4  ;;  %s22_s8 = int_to_ptr.hbm [resolvable:$true] %s21_s8 }
   0x4   :  { %s33_s28 = sshll.u32 %s615_s27, 4  ;;  %s616_s9 = smov 64   ;;  %s34_s28 = int_to_ptr.vmem [resolvable:$true] %s33_s28 }
   0x5   :  { %s617_s10 = smov 4   ;;  %s618_s11 = smov [#allocation2]  }
   0x6   :  { %39 = dma.hbm_to_vmem [thread:$0]  %s32_s26, 1024, %s34_s28, [#allocation6], %s616_s9, %s616_s9, %s617_s10  }
   0x7   :  { %s23_s12 = sshll.u32 %s618_s11, 4  ;;  %s46_s15 = sshll.u32 %s689_s3, 4  ;;  %s24_s12 = int_to_ptr.vmem [resolvable:$true] %s23_s12  ;;  %s47_s15 = int_to_ptr.hbm [resolvable:$true] %s46_s15 }
   0x8   :  { %26 = dma.hbm_to_vmem [thread:$0]  %s22_s8, 64, %s24_s12, [#allocation3]  }
   0x9   :  { %s61_s17 = sshll.u32 %s691_s5, 4  ;;  %s619_s18 = smov [#allocation7]   ;;  %s62_s17 = int_to_ptr.hbm [resolvable:$true] %s61_s17 }
   0xa   :  { %s48_s19 = sshll.u32 %s619_s18, 4  ;;  %s620_s0 = smov [#allocation8]   ;;  %s49_s19 = int_to_ptr.vmem [resolvable:$true] %s48_s19 }
   0xb   :  { %54 = dma.hbm_to_vmem [thread:$0]  %s47_s15, 1024, %s49_s19, [#allocation6], %s616_s9, %s616_s9, %s617_s10  }
   0xc   :  { %s63_s20 = sshll.u32 %s620_s0, 4  ;;  %s64_s20 = int_to_ptr.vmem [resolvable:$true] %s63_s20 }
   0xd   :  { %69 = dma.hbm_to_vmem [thread:$0]  %s62_s17, 1024, %s64_s20, [#allocation9], %s616_s9, %s616_s9, %s617_s10  }
   0xe   :  { %607 = dma.done.wait [#allocation3], 64  }
   0xf   :  { %608 = vsyncadd [#allocation3], 4294967232 }
  0x10   :  { %609 = dma.done.wait [#allocation6], 2048  }
  0x11   :  { %610 = vsyncadd [#allocation6], 4294965248 }
  0x12   :  { %611 = dma.done.wait [#allocation9], 1024  }
  0x13   :  { %612 = vsyncadd [#allocation9], 4294966272  ;;  %v460_v0 = vld [vmem:[#allocation5 + $0x38] sm:$0xff]  ;;  %v459_v1 = vld [vmem:[#allocation5 + $0x30] sm:$0xff]  ;;  %s621_s24 = smov [#allocation10]   ;;  %s345_s28 = sshll.u32 %s693_s7, 4  ;;  %s346_s28 = int_to_ptr.hbm [resolvable:$true] %s345_s28 }
  0x14   :  { %157 = vmatpush.bf16.msra.mxu0 %v460_v0  ;;  %v468_v2 = vld [vmem:[#allocation7 + $0x38] sm:$0xff]  ;;  %v467_v3 = vld [vmem:[#allocation7 + $0x30] sm:$0xff]  ;;  %v458_v4 = vld [vmem:[#allocation5 + $0x28] sm:$0xff]  ;;  %s343_s25 = sshll.u32 %s621_s24, 4  ;;  %s344_s25 = int_to_ptr.vmem [resolvable:$true] %s343_s25 }
  0x15   :  { %240 = vmatpush.bf16.msra.mxu1 %v468_v2  ;;  %v466_v5 = vld [vmem:[#allocation7 + $0x28] sm:$0xff]  ;;  %v457_v6 = vld [vmem:[#allocation5 + $0x20] sm:$0xff]  ;;  %v456_v8 = vld [vmem:[#allocation5 + $0x18] sm:$0xff] }
  0x16   :  { %v465_v7 = vld [vmem:[#allocation7 + $0x20] sm:$0xff]  ;;  %v464_v9 = vld [vmem:[#allocation7 + $0x18] sm:$0xff]  ;;  %v455_v10 = vld [vmem:[#allocation5 + $0x10] sm:$0xff] }
  0x17   :  { %v463_v11 = vld [vmem:[#allocation7 + $0x10] sm:$0xff]  ;;  %v454_v12 = vld [vmem:[#allocation5 + $0x8] sm:$0xff]  ;;  %v453_v13 = vld [vmem:[#allocation5] sm:$0xff] }
  0x18   :  { %158 = vmatpush.bf16.msra.mxu0 %v459_v1  ;;  %v88_v14 = vld [vmem:[#allocation2] sm:$0xf]  ;;  %v462_v15 = vld [vmem:[#allocation7 + $0x8] sm:$0xff]  ;;  %v461_v16 = vld [vmem:[#allocation7] sm:$0xff] }
  0x19   :  { %241 = vmatpush.bf16.msra.mxu1 %v467_v3  ;;  %v476_v17 = vld [vmem:[#allocation8 + $0x38] sm:$0xff]  ;;  %v475_v18 = vld [vmem:[#allocation8 + $0x30] sm:$0xff]  ;;  %v474_v19 = vld [vmem:[#allocation8 + $0x28] sm:$0xff] }
  0x1a   :  { %323 = vmatpush.bf16.msra.mxu2 %v476_v17  ;;  %v473_v20 = vld [vmem:[#allocation8 + $0x20] sm:$0xff]  ;;  %v472_v21 = vld [vmem:[#allocation8 + $0x18] sm:$0xff]  ;;  %v471_v22 = vld [vmem:[#allocation8 + $0x10] sm:$0xff] }
  0x1b   :  { %v484_v23 = vld [vmem:[%s688_s2] ss:$0 sm:$0xff]  ;;  %v470_v29 = vld [vmem:[#allocation8 + $0x8] sm:$0xff]  ;;  %v469_v30 = vld [vmem:[#allocation8] sm:$0xff] }
  0x1c   :  { %159 = vmatpush.bf16.msra.mxu0 %v458_v4  ;;  %v485_v31 = vld [vmem:[%s690_s4] ss:$0 sm:$0xff] }
  0x1d   :  { %242 = vmatpush.bf16.msra.mxu1 %v466_v5  ;;  %v486_v37 = vld [vmem:[%s692_s6] ss:$0 sm:$0xff] }
  0x1e   :  { %324 = vmatpush.bf16.msra.mxu2 %v475_v18 }
  0x20   :  { %160 = vmatpush.bf16.msra.mxu0 %v457_v6 }
  0x21   :  { %243 = vmatpush.bf16.msra.mxu1 %v465_v7 }
  0x22   :  { %325 = vmatpush.bf16.msra.mxu2 %v474_v19 }
  0x24   :  { %161 = vmatpush.bf16.msra.mxu0 %v456_v8 }
  0x25   :  { %244 = vmatpush.bf16.msra.mxu1 %v464_v9 }
  0x26   :  { %326 = vmatpush.bf16.msra.mxu2 %v473_v20 }
  0x28   :  { %162 = vmatpush.bf16.msra.mxu0 %v455_v10 }
  0x29   :  { %245 = vmatpush.bf16.msra.mxu1 %v463_v11 }
  0x2a   :  { %327 = vmatpush.bf16.msra.mxu2 %v472_v21 }
  0x2c   :  { %163 = vmatpush.bf16.msra.mxu0 %v454_v12 }
  0x2d   :  { %246 = vmatpush.bf16.msra.mxu1 %v462_v15 }
  0x2e   :  { %328 = vmatpush.bf16.msra.mxu2 %v471_v22 }
  0x30   :  { %164 = vmatpush.bf16.msra.mxu0 %v453_v13 }
  0x31   :  { %247 = vmatpush.bf16.msra.mxu1 %v461_v16 }
  0x32   :  { %329 = vmatpush.bf16.msra.mxu2 %v470_v29 }
  0x33   :  { %165 = vmatmul.bf16.vlgmr.msra.gmra.mxu0 %v88_v14 }
  0x36   :  { %330 = vmatpush.bf16.msra.mxu2 %v469_v30 }
  0xb0   :  { %v166_v24 = vpop.f32.mrf.mxu0 }
  0xb1   :  { %v167_v25 = vadd.f32 %v484_v23, %v166_v24 }
  0xb3   :  { %v170_v26 = vmax.f32 %v167_v25, 0.0 }
  0xb5   :  { %v171_v27 = vpack.c.bf16 %v170_v26, %v170_v26 }
  0xb7   :  { %248 = vmatmul.bf16.vlgmr.msra.gmra.mxu1 %v171_v27 }
  0xb8   :  { %v168_v28 = vpop.f32.mrf.mxu0 }
 0x134   :  { %v249_v32 = vpop.f32.mrf.mxu1 }
 0x135   :  { %v250_v33 = vadd.f32 %v485_v31, %v249_v32 }
 0x137   :  { %v253_v34 = vmax.f32 %v250_v33, 0.0 }
 0x139   :  { %v254_v35 = vpack.c.bf16 %v253_v34, %v253_v34 }
 0x13b   :  { %331 = vmatmul.bf16.vlgmr.msra.gmra.mxu2 %v254_v35 }
 0x13c   :  { %v251_v36 = vpop.f32.mrf.mxu1 }
 0x1be   :  { %v332_v38 = vpop.f32.mrf.mxu2 }
 0x1bf   :  { %v333_v39 = vadd.f32 %v486_v37, %v332_v38 }
 0x1c1   :  { %v336_v40 = vmax.f32 %v333_v39, 0.0 }
 0x1c3   :  { %337 = vst [vmem:[#allocation10] sm:$0xff] %v336_v40 }
 0x1c4   :  { %348 = dma.vmem_to_hbm [thread:$0]  %s344_s25, 128, %s346_s28, [#allocation4]  }
 0x1c6   :  { %v334_v41 = vpop.f32.mrf.mxu2 }
 0x1c7   :  { %613 = dma.done.wait [#allocation4], 128  }
 0x1c8   :  { %614 = vsyncadd [#allocation4], 4294967168 }
 0x1c9   :  { %353 = vsyncpa [#allocation3], 1 }
 0x1ca   :  { %354 = vsyncpa [#allocation6], 1 }
 0x1cb   :  { %355 = vsyncpa [#allocation9], 1 }
 0x1cc   :  { %356 = vsyncpa [#allocation4], 1 }

</bundles_post_ra>
